<compile_context>
chip_gen: v5e
topology: v5e:2x2
jax: 0.10.0
libtpu: 0.0.40
codegen_flags: <defaults>
</compile_context>

<pallas_src>
import jax
import jax.numpy as jnp
from jax.experimental import pallas as pl
from jax.experimental.pallas import tpu as pltpu


def dim_loss_kernel(fg_ref, wt_ref, b_ref, local_ref, out_ref):
    # fg_ref:    (N, D)     feat_global
    # wt_ref:    (D, C)     classifier weight, transposed
    # b_ref:     (1, C)     classifier bias
    # local_ref: (N, C, S)  feat_local_map with spatial dims merged (S = sy*sx)
    # out_ref:   (1, 1)     scalar loss (SMEM)
    N = fg_ref.shape[0]
    S = local_ref.shape[2]

    # predictions = feat_global @ W^T + b        -> (N, C); bias add is one VPU op.
    pred = jnp.dot(fg_ref[...], wt_ref[...], preferred_element_type=jnp.float32)
    pred = pred + b_ref[...]

    # Per contrastive sample j: L_j[i, s] = <pred_i, local_{j, :, s}>.
    # Static unroll over the small batch N; each is a tiny 2-D MXU matmul.
    Ls = [jnp.dot(pred, local_ref[j], preferred_element_type=jnp.float32)
          for j in range(N)]                                   # N x (N, S)

    # Stable logsumexp over the contrastive index j, per (anchor i, position s):
    # pure elementwise max/exp/add across the N small (N, S) tiles.
    m = Ls[0]
    for j in range(1, N):
        m = jnp.maximum(m, Ls[j])                              # (N, S)
    sexp = jnp.exp(Ls[0] - m)
    for j in range(1, N):
        sexp = sexp + jnp.exp(Ls[j] - m)                       # (N, S)
    lse_sum = jnp.sum(m + jnp.log(sexp))                       # scalar

    # Positive-pair term: sum_{i,s} <pred_i, local_{i,:,s}>
    #                   = sum(pred * sum_s local)   (reduce over s before the mul).
    diag_sum = jnp.sum(pred * jnp.sum(local_ref[...], axis=2))

    # loss = (1/S) * sum_s mean_i (lse - diag) = (sum lse - sum diag) / (S*N)
    out_ref[0, 0] = (lse_sum - diag_sum) * (1.0 / (S * N))


@jax.jit
def dim_loss(feat_global, feat_local_map, weight, bias):
    """feat_global: [N, state_dim], feat_local_map: [N, C, sy, sx] (NCHW),
    weight: [C, state_dim], bias: [C]. Returns scalar loss (f32)."""
    N, _ = feat_global.shape
    _, C, sy, sx = feat_local_map.shape
    S = sy * sx

    fg = feat_global.astype(jnp.float32)                       # (N, D), unpadded
    wt = weight.astype(jnp.float32).T                          # (D, C), tiny
    b = bias.astype(jnp.float32).reshape(1, C)                 # (1, C)
    local = feat_local_map.astype(jnp.float32).reshape(N, C, S)  # free reshape, no transpose

    out = pl.pallas_call(
        dim_loss_kernel,
        out_shape=jax.ShapeDtypeStruct((1, 1), jnp.float32),
        in_specs=[
            pl.BlockSpec(memory_space=pltpu.MemorySpace.VMEM),   # feat_global
            pl.BlockSpec(memory_space=pltpu.MemorySpace.VMEM),   # weight^T
            pl.BlockSpec(memory_space=pltpu.MemorySpace.VMEM),   # bias
            pl.BlockSpec(memory_space=pltpu.MemorySpace.VMEM),   # local features (N, C, S)
        ],
        out_specs=pl.BlockSpec(memory_space=pltpu.MemorySpace.SMEM),
    )(fg, wt, b, local)
    return out[0, 0]


def dim_loss_reference(feat_global, feat_local_map, weight, bias):
    """Pure-JAX reference mirroring the PyTorch forward exactly."""
    sy, sx = feat_local_map.shape[2], feat_local_map.shape[3]
    pred = feat_global @ weight.T + bias
    loss = 0.0
    for y in range(sy):
        for x in range(sx):
            pos = feat_local_map[:, :, y, x]
            logits = pred @ pos.T
            lse = jax.scipy.special.logsumexp(logits, axis=1)
            diag = jnp.diagonal(logits)
            loss = loss + jnp.mean(lse - diag)
    return loss / (sx * sy)


if __name__ == "__main__":
    # Small shapes consistent with the module: state_dim=50, local_layer_depth=32.
    N, state_dim, C, sy, sx = 8, 50, 32, 4, 4

    key = jax.random.PRNGKey(0)
    k1, k2, k3, k4 = jax.random.split(key, 4)

    feat_global = jax.random.normal(k1, (N, state_dim), dtype=jnp.float32)
    feat_local_map = jax.random.normal(k2, (N, C, sy, sx), dtype=jnp.float32)

    # Deterministic Linear(state_dim -> C) params (PyTorch-style uniform init).
    bound = 1.0 / (state_dim ** 0.5)
    weight = jax.random.uniform(k3, (C, state_dim), minval=-bound, maxval=bound,
                                dtype=jnp.float32)
    bias = jax.random.uniform(k4, (C,), minval=-bound, maxval=bound,
                              dtype=jnp.float32)

    loss = dim_loss(feat_global, feat_local_map, weight, bias)
    jax.block_until_ready(loss)

    loss_ref = dim_loss_reference(feat_global, feat_local_map, weight, bias)
    assert jnp.allclose(loss, loss_ref, atol=1e-4, rtol=1e-4), (loss, loss_ref)

    print("KERNEL_OK")
</pallas_src>

<mosaic_0001>
module attributes {stable_mosaic.version = 11 : i64} {
  func.func @dim_loss_kernel(%arg0: memref<8x50xf32, #tpu.memory_space<vmem>>, %arg1: memref<50x32xf32, #tpu.memory_space<vmem>>, %arg2: memref<1x32xf32, #tpu.memory_space<vmem>>, %arg3: memref<8x32x16xf32, #tpu.memory_space<vmem>>, %arg4: memref<1x1xf32, #tpu.memory_space<smem>>) attributes {dimension_semantics = [], scalar_prefetch = 0 : i64, scratch_operands = 0 : i64, tpu.core_type = #tpu.core_type<tc>} {
    %c0 = arith.constant 0 : index
    %c0_0 = arith.constant 0 : index
    %0 = vector.load %arg0[%c0, %c0_0] : memref<8x50xf32, #tpu.memory_space<vmem>>, vector<8x50xf32>
    %c0_1 = arith.constant 0 : index
    %c0_2 = arith.constant 0 : index
    %1 = vector.load %arg1[%c0_1, %c0_2] : memref<50x32xf32, #tpu.memory_space<vmem>>, vector<50x32xf32>
    %cst = arith.constant dense<0.000000e+00> : vector<8x32xf32>
    %2 = tpu.matmul %0, %1, %cst {dimension_numbers = #tpu.dot_dimension_numbers<[1], [0], [0], [1], [0, 0, 1, 1], [], []>} : vector<8x50xf32>, vector<50x32xf32>, vector<8x32xf32> -> vector<8x32xf32>
    %c0_3 = arith.constant 0 : index
    %c0_4 = arith.constant 0 : index
    %3 = vector.load %arg2[%c0_3, %c0_4] : memref<1x32xf32, #tpu.memory_space<vmem>>, vector<1x32xf32>
    %4 = vector.broadcast %3 : vector<1x32xf32> to vector<8x32xf32>
    %5 = arith.addf %2, %4 : vector<8x32xf32>
    %c0_5 = arith.constant 0 : index
    %c0_6 = arith.constant 0 : index
    %c0_7 = arith.constant 0 : index
    %6 = vector.load %arg3[%c0_5, %c0_6, %c0_7] : memref<8x32x16xf32, #tpu.memory_space<vmem>>, vector<1x32x16xf32>
    %7 = vector.shape_cast %6 : vector<1x32x16xf32> to vector<32x16xf32>
    %cst_8 = arith.constant dense<0.000000e+00> : vector<8x16xf32>
    %8 = tpu.matmul %5, %7, %cst_8 {dimension_numbers = #tpu.dot_dimension_numbers<[1], [0], [0], [1], [0, 0, 1, 1], [], []>} : vector<8x32xf32>, vector<32x16xf32>, vector<8x16xf32> -> vector<8x16xf32>
    %c1 = arith.constant 1 : index
    %c0_9 = arith.constant 0 : index
    %c0_10 = arith.constant 0 : index
    %9 = vector.load %arg3[%c1, %c0_9, %c0_10] : memref<8x32x16xf32, #tpu.memory_space<vmem>>, vector<1x32x16xf32>
    %10 = vector.shape_cast %9 : vector<1x32x16xf32> to vector<32x16xf32>
    %cst_11 = arith.constant dense<0.000000e+00> : vector<8x16xf32>
    %11 = tpu.matmul %5, %10, %cst_11 {dimension_numbers = #tpu.dot_dimension_numbers<[1], [0], [0], [1], [0, 0, 1, 1], [], []>} : vector<8x32xf32>, vector<32x16xf32>, vector<8x16xf32> -> vector<8x16xf32>
    %c2 = arith.constant 2 : index
    %c0_12 = arith.constant 0 : index
    %c0_13 = arith.constant 0 : index
    %12 = vector.load %arg3[%c2, %c0_12, %c0_13] : memref<8x32x16xf32, #tpu.memory_space<vmem>>, vector<1x32x16xf32>
    %13 = vector.shape_cast %12 : vector<1x32x16xf32> to vector<32x16xf32>
    %cst_14 = arith.constant dense<0.000000e+00> : vector<8x16xf32>
    %14 = tpu.matmul %5, %13, %cst_14 {dimension_numbers = #tpu.dot_dimension_numbers<[1], [0], [0], [1], [0, 0, 1, 1], [], []>} : vector<8x32xf32>, vector<32x16xf32>, vector<8x16xf32> -> vector<8x16xf32>
    %c3 = arith.constant 3 : index
    %c0_15 = arith.constant 0 : index
    %c0_16 = arith.constant 0 : index
    %15 = vector.load %arg3[%c3, %c0_15, %c0_16] : memref<8x32x16xf32, #tpu.memory_space<vmem>>, vector<1x32x16xf32>
    %16 = vector.shape_cast %15 : vector<1x32x16xf32> to vector<32x16xf32>
    %cst_17 = arith.constant dense<0.000000e+00> : vector<8x16xf32>
    %17 = tpu.matmul %5, %16, %cst_17 {dimension_numbers = #tpu.dot_dimension_numbers<[1], [0], [0], [1], [0, 0, 1, 1], [], []>} : vector<8x32xf32>, vector<32x16xf32>, vector<8x16xf32> -> vector<8x16xf32>
    %c4 = arith.constant 4 : index
    %c0_18 = arith.constant 0 : index
    %c0_19 = arith.constant 0 : index
    %18 = vector.load %arg3[%c4, %c0_18, %c0_19] : memref<8x32x16xf32, #tpu.memory_space<vmem>>, vector<1x32x16xf32>
    %19 = vector.shape_cast %18 : vector<1x32x16xf32> to vector<32x16xf32>
    %cst_20 = arith.constant dense<0.000000e+00> : vector<8x16xf32>
    %20 = tpu.matmul %5, %19, %cst_20 {dimension_numbers = #tpu.dot_dimension_numbers<[1], [0], [0], [1], [0, 0, 1, 1], [], []>} : vector<8x32xf32>, vector<32x16xf32>, vector<8x16xf32> -> vector<8x16xf32>
    %c5 = arith.constant 5 : index
    %c0_21 = arith.constant 0 : index
    %c0_22 = arith.constant 0 : index
    %21 = vector.load %arg3[%c5, %c0_21, %c0_22] : memref<8x32x16xf32, #tpu.memory_space<vmem>>, vector<1x32x16xf32>
    %22 = vector.shape_cast %21 : vector<1x32x16xf32> to vector<32x16xf32>
    %cst_23 = arith.constant dense<0.000000e+00> : vector<8x16xf32>
    %23 = tpu.matmul %5, %22, %cst_23 {dimension_numbers = #tpu.dot_dimension_numbers<[1], [0], [0], [1], [0, 0, 1, 1], [], []>} : vector<8x32xf32>, vector<32x16xf32>, vector<8x16xf32> -> vector<8x16xf32>
    %c6 = arith.constant 6 : index
    %c0_24 = arith.constant 0 : index
    %c0_25 = arith.constant 0 : index
    %24 = vector.load %arg3[%c6, %c0_24, %c0_25] : memref<8x32x16xf32, #tpu.memory_space<vmem>>, vector<1x32x16xf32>
    %25 = vector.shape_cast %24 : vector<1x32x16xf32> to vector<32x16xf32>
    %cst_26 = arith.constant dense<0.000000e+00> : vector<8x16xf32>
    %26 = tpu.matmul %5, %25, %cst_26 {dimension_numbers = #tpu.dot_dimension_numbers<[1], [0], [0], [1], [0, 0, 1, 1], [], []>} : vector<8x32xf32>, vector<32x16xf32>, vector<8x16xf32> -> vector<8x16xf32>
    %c7 = arith.constant 7 : index
    %c0_27 = arith.constant 0 : index
    %c0_28 = arith.constant 0 : index
    %27 = vector.load %arg3[%c7, %c0_27, %c0_28] : memref<8x32x16xf32, #tpu.memory_space<vmem>>, vector<1x32x16xf32>
    %28 = vector.shape_cast %27 : vector<1x32x16xf32> to vector<32x16xf32>
    %cst_29 = arith.constant dense<0.000000e+00> : vector<8x16xf32>
    %29 = tpu.matmul %5, %28, %cst_29 {dimension_numbers = #tpu.dot_dimension_numbers<[1], [0], [0], [1], [0, 0, 1, 1], [], []>} : vector<8x32xf32>, vector<32x16xf32>, vector<8x16xf32> -> vector<8x16xf32>
    %30 = arith.maximumf %8, %11 : vector<8x16xf32>
    %31 = arith.maximumf %30, %14 : vector<8x16xf32>
    %32 = arith.maximumf %31, %17 : vector<8x16xf32>
    %33 = arith.maximumf %32, %20 : vector<8x16xf32>
    %34 = arith.maximumf %33, %23 : vector<8x16xf32>
    %35 = arith.maximumf %34, %26 : vector<8x16xf32>
    %36 = arith.maximumf %35, %29 : vector<8x16xf32>
    %37 = arith.subf %8, %36 : vector<8x16xf32>
    %38 = math.exp %37 : vector<8x16xf32>
    %39 = arith.subf %11, %36 : vector<8x16xf32>
    %40 = math.exp %39 : vector<8x16xf32>
    %41 = arith.addf %38, %40 : vector<8x16xf32>
    %42 = arith.subf %14, %36 : vector<8x16xf32>
    %43 = math.exp %42 : vector<8x16xf32>
    %44 = arith.addf %41, %43 : vector<8x16xf32>
    %45 = arith.subf %17, %36 : vector<8x16xf32>
    %46 = math.exp %45 : vector<8x16xf32>
    %47 = arith.addf %44, %46 : vector<8x16xf32>
    %48 = arith.subf %20, %36 : vector<8x16xf32>
    %49 = math.exp %48 : vector<8x16xf32>
    %50 = arith.addf %47, %49 : vector<8x16xf32>
    %51 = arith.subf %23, %36 : vector<8x16xf32>
    %52 = math.exp %51 : vector<8x16xf32>
    %53 = arith.addf %50, %52 : vector<8x16xf32>
    %54 = arith.subf %26, %36 : vector<8x16xf32>
    %55 = math.exp %54 : vector<8x16xf32>
    %56 = arith.addf %53, %55 : vector<8x16xf32>
    %57 = arith.subf %29, %36 : vector<8x16xf32>
    %58 = math.exp %57 : vector<8x16xf32>
    %59 = arith.addf %56, %58 : vector<8x16xf32>
    %60 = math.log %59 : vector<8x16xf32>
    %61 = arith.addf %36, %60 : vector<8x16xf32>
    %62 = vector.shape_cast %61 : vector<8x16xf32> to vector<1x8x16xf32>
    %cst_30 = arith.constant dense<0.000000e+00> : vector<1xf32>
    %63 = vector.multi_reduction <add>, %62, %cst_30 [1, 2] : vector<1x8x16xf32> to vector<1xf32>
    %64 = vector.shape_cast %63 : vector<1xf32> to vector<1x1x1xf32>
    %65 = vector.extract %64[0, 0, 0] : f32 from vector<1x1x1xf32>
    %c0_31 = arith.constant 0 : index
    %c0_32 = arith.constant 0 : index
    %c0_33 = arith.constant 0 : index
    %66 = vector.load %arg3[%c0_31, %c0_32, %c0_33] : memref<8x32x16xf32, #tpu.memory_space<vmem>>, vector<8x32x16xf32>
    %cst_34 = arith.constant dense<0.000000e+00> : vector<8x32xf32>
    %67 = vector.multi_reduction <add>, %66, %cst_34 [2] : vector<8x32x16xf32> to vector<8x32xf32>
    %68 = arith.mulf %5, %67 : vector<8x32xf32>
    %69 = vector.shape_cast %68 : vector<8x32xf32> to vector<1x8x32xf32>
    %cst_35 = arith.constant dense<0.000000e+00> : vector<1xf32>
    %70 = vector.multi_reduction <add>, %69, %cst_35 [1, 2] : vector<1x8x32xf32> to vector<1xf32>
    %71 = vector.shape_cast %70 : vector<1xf32> to vector<1x1x1xf32>
    %72 = vector.extract %71[0, 0, 0] : f32 from vector<1x1x1xf32>
    %73 = arith.subf %65, %72 : f32
    %cst_36 = arith.constant 7.812500e-03 : f32
    %74 = arith.mulf %73, %cst_36 : f32
    %c0_37 = arith.constant 0 : index
    %c0_38 = arith.constant 0 : index
    %75 = memref.load %arg4[%c0_37, %c0_38] : memref<1x1xf32, #tpu.memory_space<smem>>
    memref.store %74, %arg4[%c0_37, %c0_38] : memref<1x1xf32, #tpu.memory_space<smem>>
    return
  }
}

</mosaic_0001>

<bundles_post_ra>
// kernel: dim_loss.1
= control target key start
LH: loop header
LB: loop body
LE: loop exit
PB: predicated region body
PF: predicated region fallthrough
CT: control target
= control target key end

     0   :  { %vm34_vm0 = vcmask 1041408   ;;  %vm302_vm1 = vcmask 130048   ;;  %s934_s0 = inlined_call_operand.vmem [shape: f32[8,50], index: 0, kind: input, shape index: {}]   ;;  %s935_s1 = inlined_call_operand.vmem [shape: f32[50,32], index: 1, kind: input, shape index: {}]   ;;  %s936_s2 = inlined_call_operand.vmem [shape: f32[1,32], index: 2, kind: input, shape index: {}]   ;;  %s937_s3 = inlined_call_operand.vmem [shape: f32[8,32,16], index: 3, kind: input, shape index: {}]   ;;  %s938_s4 = inlined_call_operand.hbm [shape: f32[1,1], index: 4, kind: output, shape index: {}]  }
   0x1   :  { %v25_v0 = vld [vmem:[%s935_s1 + $0x30] sm:$0x3]  ;;  %v313_v1 = vld [vmem:[%s937_s3] sm:$0xff]  ;;  %v24_v5 = vld [vmem:[%s935_s1 + $0x28] sm:$0xff] }
   0x2   :  { %v317_v2 = vld [vmem:[%s937_s3 + $0x20] sm:$0xff]  ;;  %582 = vmatpush.msk.msra.mxu0 %vm34_vm0, %v25_v0  ;;  %v345_v3 = vsel %vm302_vm1, %v313_v1, 0.0  ;;  %v315_v7 = vld [vmem:[%s937_s3 + $0x10] sm:$0xff]  ;;  %v22_v9 = vld [vmem:[%s935_s1 + $0x18] sm:$0xff] }
   0x3   :  { %v357_v4 = vsel %vm302_vm1, %v317_v2, 0.0  ;;  %346 = vadd.xlane.f32.xlu0 %v345_v3  ;;  %v23_v6 = vld [vmem:[%s935_s1 + $0x20] sm:$0xff]  ;;  %v351_v8 = vsel %vm302_vm1, %v315_v7, 0.0  ;;  %v314_v10 = vld [vmem:[%s937_s3 + $0x8] sm:$0xff]  ;;  %v316_v12 = vld [vmem:[%s937_s3 + $0x18] sm:$0xff] }
   0x4   :  { %358 = vadd.xlane.f32.xlu1 %v357_v4  ;;  %48 = vmatpush.msra.mxu0 %v24_v5  ;;  %v318_v11 = vld [vmem:[%s937_s3 + $0x28] sm:$0xff]  ;;  %v320_v13 = vld [vmem:[%s937_s3 + $0x38] sm:$0xff]  ;;  %v21_v14 = vld [vmem:[%s935_s1 + $0x10] sm:$0xff]  ;;  %v348_v16 = vsel %vm302_vm1, %v314_v10, 0.0 }
   0x5   :  { %352 = vadd.xlane.f32.xlu2 %v351_v8  ;;  %v319_v15 = vld [vmem:[%s937_s3 + $0x30] sm:$0xff]  ;;  %78 = vmatpush.msra.mxu1 %v316_v12  ;;  %v360_v17 = vsel %vm302_vm1, %v318_v11, 0.0  ;;  %v324_v18 = vld [vmem:[%s937_s3 + $0x58] sm:$0xff]  ;;  %v20_v19 = vld [vmem:[%s935_s1 + $0x8] sm:$0xff] }
   0x6   :  { %49 = vmatpush.msra.mxu0 %v23_v6  ;;  %103 = vmatpush.msra.mxu2 %v320_v13  ;;  %v363_v20 = vsel %vm302_vm1, %v319_v15, 0.0 }
   0x7   :  { %128 = vmatpush.msra.mxu3 %v324_v18  ;;  %79 = vmatpush.msra.mxu1 %v315_v7 }
   0x8   :  { %50 = vmatpush.msra.mxu0 %v22_v9  ;;  %104 = vmatpush.msra.mxu2 %v319_v15 }
   0xa   :  { %51 = vmatpush.msra.mxu0 %v21_v14 }
   0xb   :  { %9 = vsyncpa [#allocation3], 0  ;;  %349 = vadd.xlane.f32.xlu0 %v348_v16  ;;  %v19_v21 = vld [vmem:[%s935_s1] sm:$0xff]  ;;  %v323_v22 = vld [vmem:[%s937_s3 + $0x50] sm:$0xff]  ;;  %vm30_vm2 = vcmask 408576   ;;  %80 = vmatpush.msra.mxu1 %v314_v10  ;;  %v354_v29 = vsel %vm302_vm1, %v316_v12, 0.0  ;;  %v473_v8 = vlaneseq }
   0xc   :  { %361 = vadd.xlane.f32.xlu1 %v360_v17  ;;  %52 = vmatpush.msra.mxu0 %v20_v19  ;;  %v18_v23 = vld [vmem:[%s934_s0] sm:$0xff]  ;;  %v322_v25 = vld [vmem:[%s937_s3 + $0x48] sm:$0xff]  ;;  %v328_v28 = vld [vmem:[%s937_s3 + $0x78] sm:$0xff]  ;;  %v366_v35 = vsel %vm302_vm1, %v320_v13, 0.0  ;;  %v375_v36 = vsel %vm302_vm1, %v323_v22, 0.0  ;;  %v378_v41 = vsel %vm302_vm1, %v324_v18, 0.0 }
   0xd   :  { %129 = vmatpush.msra.mxu3 %v323_v22  ;;  %364 = vadd.xlane.f32.xlu2 %v363_v20  ;;  %v321_v24 = vld [vmem:[%s937_s3 + $0x40] sm:$0xff]  ;;  %v372_v27 = vsel %vm302_vm1, %v322_v25, 0.0  ;;  %v327_v30 = vld [vmem:[%s937_s3 + $0x70] sm:$0xff]  ;;  %v326_v31 = vld [vmem:[%s937_s3 + $0x68] sm:$0xff]  ;;  %v390_v49 = vsel %vm302_vm1, %v328_v28, 0.0  ;;  %v839_v9 = vand.u32 127, %v473_v8 }
   0xe   :  { %53 = vmatpush.msra.mxu0 %v19_v21  ;;  %105 = vmatpush.msra.mxu2 %v318_v11  ;;  %v369_v26 = vsel %vm302_vm1, %v321_v24, 0.0  ;;  %v332_v32 = vld [vmem:[%s937_s3 + $0x98] sm:$0xff]  ;;  %v325_v33 = vld [vmem:[%s937_s3 + $0x60] sm:$0xff]  ;;  %v331_v34 = vld [vmem:[%s937_s3 + $0x90] sm:$0xff]  ;;  %v384_v40 = vsel %vm302_vm1, %v326_v31, 0.0  ;;  %v387_v42 = vsel %vm302_vm1, %v327_v30, 0.0 }
   0xf   :  { %583 = vmatmul.msk.f32.vlgmr.msra.gmra.mxu0 %vm30_vm2, %v18_v23  ;;  %130 = vmatpush.msra.mxu3 %v322_v25  ;;  %v330_v37 = vld [vmem:[%s937_s3 + $0x88] sm:$0xff]  ;;  %v381_v38 = vsel %vm302_vm1, %v325_v33, 0.0  ;;  %v329_v39 = vld [vmem:[%s937_s3 + $0x80] sm:$0xff]  ;;  %v336_v43 = vld [vmem:[%s937_s3 + $0xb8] sm:$0xff]  ;;  %v399_v53 = vsel %vm302_vm1, %v331_v34, 0.0  ;;  %v402_v57 = vsel %vm302_vm1, %v332_v32, 0.0 }
  0x10   :  { %81 = vmatpush.msra.mxu1 %v313_v1  ;;  %106 = vmatpush.msra.mxu2 %v317_v2  ;;  %v335_v44 = vld [vmem:[%s937_s3 + $0xb0] sm:$0xff]  ;;  %v334_v45 = vld [vmem:[%s937_s3 + $0xa8] sm:$0xff]  ;;  %v393_v46 = vsel %vm302_vm1, %v329_v39, 0.0  ;;  %v396_v47 = vsel %vm302_vm1, %v330_v37, 0.0  ;;  %v333_v48 = vld [vmem:[%s937_s3 + $0xa0] sm:$0xff]  ;;  %v414_v61 = vsel %vm302_vm1, %v336_v43, 0.0 }
  0x11   :  { %131 = vmatpush.msra.mxu3 %v321_v24  ;;  %v340_v50 = vld [vmem:[%s937_s3 + $0xd8] sm:$0xff]  ;;  %v339_v51 = vld [vmem:[%s937_s3 + $0xd0] sm:$0xff]  ;;  %v338_v52 = vld [vmem:[%s937_s3 + $0xc8] sm:$0xff]  ;;  %v405_v54 = vsel %vm302_vm1, %v333_v48, 0.0  ;;  %v408_v56 = vsel %vm302_vm1, %v334_v45, 0.0  ;;  %v411_v58 = vsel %vm302_vm1, %v335_v44, 0.0 }
  0x12   :  { %153 = vmatpush.msrb.mxu1 %v328_v28  ;;  %178 = vmatpush.msrb.mxu2 %v332_v32  ;;  %v337_v55 = vld [vmem:[%s937_s3 + $0xc0] sm:$0xff]  ;;  %v420_v60 = vsel %vm302_vm1, %v338_v52, 0.0  ;;  %v423_v62 = vsel %vm302_vm1, %v339_v51, 0.0  ;;  %v342_v0 = vld [vmem:[%s937_s3 + $0xe8] sm:$0xff]  ;;  %v426_v3 = vsel %vm302_vm1, %v340_v50, 0.0  ;;  %v343_v4 = vld [vmem:[%s937_s3 + $0xf0] sm:$0xff] }
  0x13   :  { %370 = vadd.xlane.f32.xlu0 %v369_v26  ;;  %203 = vmatpush.msrb.mxu3 %v336_v43  ;;  %v417_v59 = vsel %vm302_vm1, %v337_v55, 0.0  ;;  %v822_v63 = vld [vmem:[%s937_s3 + $0xe0] sm:$0xff]  ;;  %v432_v2 = vsel %vm302_vm1, %v342_v0, 0.0  ;;  %v344_v5 = vld [vmem:[%s937_s3 + $0xf8] sm:$0xff]  ;;  %v435_v6 = vsel %vm302_vm1, %v343_v4, 0.0  ;;  %v842_v13 = vadd.s32 4294967280, %v839_v9 }
  0x14   :  { %373 = vadd.xlane.f32.xlu1 %v372_v27  ;;  %154 = vmatpush.msrb.mxu1 %v327_v30  ;;  %v429_v1 = vsel %vm302_vm1, %v822_v63, 0.0  ;;  %v438_v7 = vsel %vm302_vm1, %v344_v5, 0.0  ;;  %v845_v14 = vadd.s32 4294967288, %v839_v9  ;;  %vm478_vm3 = vcmask 130112   ;;  %v625_v30 = vld [vmem:[%s936_s2] ss:$0 sm:$0xff] }
  0x15   :  { %355 = vadd.xlane.f32.xlu2 %v354_v29  ;;  %179 = vmatpush.msrb.mxu2 %v331_v34  ;;  %vm482_vm4 = vcmask 195712   ;;  %v856_v28 = vadd.s32 4294967272, %v839_v9  ;;  %vm486_vm5 = vcmask 261312   ;;  %vm62_vm6 = vcmask 261120   ;;  %s572_s17 = sshll.u32 %s938_s4, 4  ;;  %s658_s20 = smov [#allocation2]   ;;  %s573_s17 = int_to_ptr.hbm [resolvable:$true] %s572_s17 }
  0x16   :  { %155 = vmatpush.msrb.mxu1 %v326_v31  ;;  %204 = vmatpush.msrb.mxu3 %v335_v44  ;;  %vm537_vm7 = vcmask 1041409   ;;  %vm539_vm8 = vcmask 1042434   ;;  %vm541_vm9 = vcmask 1043459   ;;  %vm543_vm10 = vcmask 1044484  }
  0x17   :  { %180 = vmatpush.msrb.mxu2 %v330_v37  ;;  %228 = vmatpush.msrb.mxu0 %v340_v50  ;;  %vm545_vm11 = vcmask 1045509   ;;  %vm547_vm12 = vcmask 1046534   ;;  %vm549_vm13 = vcmask 1047559  }
  0x18   :  { %156 = vmatpush.msrb.mxu1 %v325_v33  ;;  %205 = vmatpush.msrb.mxu3 %v334_v45 }
  0x19   :  { %181 = vmatpush.msrb.mxu2 %v329_v39  ;;  %229 = vmatpush.msrb.mxu0 %v339_v51 }
  0x1a   :  { %206 = vmatpush.msrb.mxu3 %v333_v48 }
  0x1b   :  { %367 = vadd.xlane.f32.xlu0 %v366_v35  ;;  %230 = vmatpush.msrb.mxu0 %v338_v52 }
  0x1c   :  { %376 = vadd.xlane.f32.xlu1 %v375_v36 }
  0x1d   :  { %382 = vadd.xlane.f32.xlu2 %v381_v38  ;;  %231 = vmatpush.msrb.mxu0 %v337_v55 }
  0x23   :  { %385 = vadd.xlane.f32.xlu0 %v384_v40 }
  0x24   :  { %379 = vadd.xlane.f32.xlu1 %v378_v41 }
  0x25   :  { %388 = vadd.xlane.f32.xlu2 %v387_v42 }
  0x2b   :  { %394 = vadd.xlane.f32.xlu0 %v393_v46 }
  0x2c   :  { %397 = vadd.xlane.f32.xlu1 %v396_v47 }
  0x2d   :  { %391 = vadd.xlane.f32.xlu2 %v390_v49 }
  0x33   :  { %400 = vadd.xlane.f32.xlu0 %v399_v53 }
  0x34   :  { %406 = vadd.xlane.f32.xlu1 %v405_v54 }
  0x35   :  { %409 = vadd.xlane.f32.xlu2 %v408_v56 }
  0x3b   :  { %403 = vadd.xlane.f32.xlu0 %v402_v57 }
  0x3c   :  { %412 = vadd.xlane.f32.xlu1 %v411_v58 }
  0x3d   :  { %418 = vadd.xlane.f32.xlu2 %v417_v59 }
  0x43   :  { %421 = vadd.xlane.f32.xlu0 %v420_v60 }
  0x44   :  { %415 = vadd.xlane.f32.xlu1 %v414_v61 }
  0x45   :  { %424 = vadd.xlane.f32.xlu2 %v423_v62 }
  0x4b   :  { %430 = vadd.xlane.f32.xlu0 %v429_v1 }
  0x4c   :  { %433 = vadd.xlane.f32.xlu1 %v432_v2 }
  0x4d   :  { %427 = vadd.xlane.f32.xlu2 %v426_v3 }
  0x53   :  { %436 = vadd.xlane.f32.xlu0 %v435_v6 }
  0x54   :  { %439 = vadd.xlane.f32.xlu1 %v438_v7 }
  0x76   :  { %v347_v10 = vpop.xlane.xlu0 %346 }
  0x77   :  { %v359_v11 = vpop.xlane.xlu1 %358  ;;  %v475_v15 = vperm.slane %v347_v10, %v839_v9 }
  0x78   :  { %v353_v12 = vpop.xlane.xlu2 %352  ;;  %v488_v16 = vperm.slane %v359_v11, %v839_v9 }
  0x79   :  { %v481_v17 = vperm.slane %v353_v12, %v842_v13 }
  0x7e   :  { %v350_v18 = vpop.xlane.xlu0 %349 }
  0x7f   :  { %v362_v19 = vpop.xlane.xlu1 %361  ;;  %v477_v20 = vperm.slane %v350_v18, %v845_v14 }
  0x80   :  { %v489_v21 = vperm.slane %v362_v19, %v845_v14  ;;  %v365_v22 = vpop.xlane.xlu2 %364 }
  0x81   :  { %v479_v23 = vsel %vm478_vm3, %v477_v20, %v475_v15  ;;  %v491_v31 = vperm.slane %v365_v22, %v842_v13 }
  0x82   :  { %v490_v24 = vsel %vm478_vm3, %v489_v21, %v488_v16  ;;  %v483_v25 = vsel %vm482_vm4, %v481_v17, %v479_v23 }
  0x83   :  { %v492_v35 = vsel %vm482_vm4, %v491_v31, %v490_v24 }
  0x86   :  { %v371_v26 = vpop.xlane.xlu0 %370 }
  0x87   :  { %v374_v27 = vpop.xlane.xlu1 %373  ;;  %v495_v52 = vperm.slane %v371_v26, %v839_v9 }
  0x88   :  { %v356_v29 = vpop.xlane.xlu2 %355  ;;  %v496_v53 = vperm.slane %v374_v27, %v845_v14 }
  0x89   :  { %v485_v32 = vperm.slane %v356_v29, %v856_v28 }
  0x8a   :  { %v497_v60 = vsel %vm478_vm3, %v496_v53, %v495_v52 }
  0x8b   :  { %v487_v38 = vsel %vm486_vm5, %v485_v32, %v483_v25 }
  0x8c   :  { %v55_v33 = vpop.f32.mrf.mxu0 }
  0x8d   :  { %v863_v34 = vadd.f32 %v625_v30, %v55_v33 }
  0x8e   :  { %v368_v36 = vpop.xlane.xlu0 %367 }
  0x8f   :  { %v377_v37 = vpop.xlane.xlu1 %376  ;;  %v493_v39 = vperm.slane %v368_v36, %v856_v28  ;;  %584 = vmatmul.msk.f32.vlgmr.msra.gmra.mxu1 %vm62_vm6, %v863_v34  ;;  %589 = vmatmul.msk.f32.vlgmr.msra.gmra.mxu2 %vm62_vm6, %v863_v34 }
  0x90   :  { %594 = vmatmul.msk.f32.vlgmr.msra.gmra.mxu3 %vm62_vm6, %v863_v34  ;;  %614 = vmatmul.msk.f32.vlgmr.msrb.gmra.mxu0 %vm62_vm6, %v863_v34  ;;  %v383_v40 = vpop.xlane.xlu2 %382  ;;  %v498_v56 = vperm.slane %v377_v37, %v842_v13 }
  0x91   :  { %v494_v41 = vsel %vm486_vm5, %v493_v39, %v492_v35  ;;  %253 = vmatpush.msra.mxu1 %v344_v5  ;;  %v502_v57 = vperm.slane %v383_v40, %v839_v9 }
  0x92   :  { %v538_v42 = vsel %vm537_vm7, %v494_v41, %v487_v38 }
  0x93   :  { %254 = vmatpush.msra.mxu1 %v343_v4 }
  0x95   :  { %255 = vmatpush.msra.mxu1 %v342_v0 }
  0x96   :  { %v386_v43 = vpop.xlane.xlu0 %385 }
  0x97   :  { %v380_v44 = vpop.xlane.xlu1 %379  ;;  %599 = vmatmul.msk.f32.vlgmr.msrb.gmra.mxu1 %vm62_vm6, %v863_v34  ;;  %604 = vmatmul.msk.f32.vlgmr.msrb.gmra.mxu2 %vm62_vm6, %v863_v34  ;;  %v503_v58 = vperm.slane %v386_v43, %v845_v14 }
  0x98   :  { %609 = vmatmul.msk.f32.vlgmr.msrb.gmra.mxu3 %vm62_vm6, %v863_v34  ;;  %v389_v45 = vpop.xlane.xlu2 %388  ;;  %256 = vmatpush.msra.mxu1 %v822_v63  ;;  %v500_v61 = vperm.slane %v380_v44, %v856_v28  ;;  %v499_v63 = vsel %vm482_vm4, %v498_v56, %v497_v60 }
  0x99   :  { %v505_v62 = vperm.slane %v389_v45, %v842_v13  ;;  %v504_v0 = vsel %vm478_vm3, %v503_v58, %v502_v57 }
  0x9a   :  { %v501_v6 = vsel %vm486_vm5, %v500_v61, %v499_v63 }
  0x9b   :  { %v506_v7 = vsel %vm482_vm4, %v505_v62, %v504_v0  ;;  %v540_v16 = vsel %vm539_vm8, %v501_v6, %v538_v42 }
  0x9e   :  { %v395_v46 = vpop.xlane.xlu0 %394 }
  0x9f   :  { %v398_v47 = vpop.xlane.xlu1 %397  ;;  %619 = vmatmul.msk.f32.vlgmr.msra.gmra.mxu1 %vm62_vm6, %v863_v34  ;;  %v509_v1 = vperm.slane %v395_v46, %v839_v9 }
  0xa0   :  { %v392_v48 = vpop.xlane.xlu2 %391  ;;  %v510_v2 = vperm.slane %v398_v47, %v845_v14 }
  0xa1   :  { %v507_v3 = vperm.slane %v392_v48, %v856_v28 }
  0xa2   :  { %v511_v10 = vsel %vm478_vm3, %v510_v2, %v509_v1 }
  0xa3   :  { %v508_v17 = vsel %vm486_vm5, %v507_v3, %v506_v7 }
  0xa4   :  { %v542_v24 = vsel %vm541_vm9, %v508_v17, %v540_v16 }
  0xa6   :  { %v401_v49 = vpop.xlane.xlu0 %400 }
  0xa7   :  { %v407_v50 = vpop.xlane.xlu1 %406  ;;  %v512_v8 = vperm.slane %v401_v49, %v842_v13 }
  0xa8   :  { %v410_v51 = vpop.xlane.xlu2 %409  ;;  %v516_v11 = vperm.slane %v407_v50, %v839_v9 }
  0xa9   :  { %v517_v12 = vperm.slane %v410_v51, %v845_v14  ;;  %v513_v19 = vsel %vm482_vm4, %v512_v8, %v511_v10 }
  0xab   :  { %v518_v23 = vsel %vm478_vm3, %v517_v12, %v516_v11 }
  0xae   :  { %v404_v54 = vpop.xlane.xlu0 %403 }
  0xaf   :  { %v413_v55 = vpop.xlane.xlu1 %412  ;;  %v514_v18 = vperm.slane %v404_v54, %v856_v28 }
  0xb0   :  { %v419_v59 = vpop.xlane.xlu2 %418  ;;  %v519_v20 = vperm.slane %v413_v55, %v842_v13 }
  0xb1   :  { %v523_v21 = vperm.slane %v419_v59, %v839_v9  ;;  %v515_v25 = vsel %vm486_vm5, %v514_v18, %v513_v19 }
  0xb2   :  { %v520_v31 = vsel %vm482_vm4, %v519_v20, %v518_v23  ;;  %v544_v35 = vsel %vm543_vm10, %v515_v25, %v542_v24 }
  0xb6   :  { %v422_v4 = vpop.xlane.xlu0 %421 }
  0xb7   :  { %v416_v5 = vpop.xlane.xlu1 %415  ;;  %v524_v22 = vperm.slane %v422_v4, %v845_v14 }
  0xb8   :  { %v425_v15 = vpop.xlane.xlu2 %424  ;;  %v521_v26 = vperm.slane %v416_v5, %v856_v28 }
  0xb9   :  { %v526_v27 = vperm.slane %v425_v15, %v842_v13  ;;  %v525_v32 = vsel %vm478_vm3, %v524_v22, %v523_v21 }
  0xba   :  { %v522_v37 = vsel %vm486_vm5, %v521_v26, %v520_v31 }
  0xbb   :  { %v527_v38 = vsel %vm482_vm4, %v526_v27, %v525_v32  ;;  %v546_v41 = vsel %vm545_vm11, %v522_v37, %v544_v35 }
  0xbe   :  { %v431_v29 = vpop.xlane.xlu0 %430 }
  0xbf   :  { %v434_v30 = vpop.xlane.xlu1 %433  ;;  %v530_v39 = vperm.slane %v431_v29, %v839_v9 }
  0xc0   :  { %v428_v33 = vpop.xlane.xlu2 %427  ;;  %v531_v40 = vperm.slane %v434_v30, %v845_v14 }
  0xc1   :  { %v528_v36 = vperm.slane %v428_v33, %v856_v28 }
  0xc2   :  { %v532_v43 = vsel %vm478_vm3, %v531_v40, %v530_v39 }
  0xc3   :  { %v529_v42 = vsel %vm486_vm5, %v528_v36, %v527_v38 }
  0xc4   :  { %v548_v48 = vsel %vm547_vm12, %v529_v42, %v546_v41 }
  0xc6   :  { %v437_v44 = vpop.xlane.xlu0 %436 }
  0xc7   :  { %v440_v45 = vpop.xlane.xlu1 %439  ;;  %v533_v46 = vperm.slane %v437_v44, %v842_v13 }
  0xc8   :  { %v535_v47 = vperm.slane %v440_v45, %v856_v28 }
  0xc9   :  { %v534_v49 = vsel %vm482_vm4, %v533_v46, %v532_v43 }
  0xca   :  { %v536_v9 = vsel %vm486_vm5, %v535_v47, %v534_v49 }
  0xcb   :  { %v550_v50 = vsel %vm549_vm13, %v536_v9, %v548_v48 }
  0xcc   :  { %v552_v14 = vmul.f32 %v550_v50, %v863_v34 }
  0xce   :  { %v553_v51 = vsel %vm62_vm6, %v552_v14, 0.0 }
  0xcf   :  { %554 = vadd.xlane.f32.xlu0 %v553_v51 }
 0x10c   :  { %v83_v52 = vpop.f32.mrf.mxu1 }
 0x10d   :  { %v233_v61 = vpop.f32.mrf.mxu0 }
 0x112   :  { %v108_v53 = vpop.f32.mrf.mxu2 }
 0x113   :  { %v261_v54 = vmax.f32 %v83_v52, %v108_v53  ;;  %v133_v55 = vpop.f32.mrf.mxu3 }
 0x114   :  { %v158_v13 = vpop.f32.mrf.mxu1 }
 0x115   :  { %v262_v56 = vmax.f32 %v261_v54, %v133_v55 }
 0x117   :  { %v263_v57 = vmax.f32 %v262_v56, %v158_v13 }
 0x11a   :  { %v183_v28 = vpop.f32.mrf.mxu2 }
 0x11b   :  { %v264_v58 = vmax.f32 %v263_v57, %v183_v28  ;;  %v208_v59 = vpop.f32.mrf.mxu3 }
 0x11c   :  { %v258_v63 = vpop.f32.mrf.mxu1 }
 0x11d   :  { %v265_v60 = vmax.f32 %v264_v58, %v208_v59 }
 0x11f   :  { %v266_v62 = vmax.f32 %v265_v60, %v233_v61 }
 0x121   :  { %v267_v0 = vmax.f32 %v266_v62, %v258_v63 }
 0x123   :  { %v268_v1 = vsub.f32 %v83_v52, %v267_v0  ;;  %v271_v34 = vsub.f32 %v108_v53, %v267_v0  ;;  %v275_v2 = vsub.f32 %v133_v55, %v267_v0  ;;  %v279_v5 = vsub.f32 %v158_v13, %v267_v0 }
 0x124   :  { %v283_v7 = vsub.f32 %v183_v28, %v267_v0  ;;  %v287_v10 = vsub.f32 %v208_v59, %v267_v0  ;;  %v291_v12 = vsub.f32 %v233_v61, %v267_v0  ;;  %v295_v15 = vsub.f32 %v258_v63, %v267_v0 }
 0x125   :  { %v269_v3 = vmul.f32 1.442695, %v268_v1  ;;  %v272_v4 = vmul.f32 1.442695, %v271_v34  ;;  %v276_v6 = vmul.f32 1.442695, %v275_v2 }
 0x126   :  { %v280_v8 = vmul.f32 1.442695, %v279_v5  ;;  %v284_v11 = vmul.f32 1.442695, %v283_v7  ;;  %v288_v16 = vmul.f32 1.442695, %v287_v10 }
 0x127   :  { %626 = vpow2.f32 %v269_v3  ;;  %v292_v19 = vmul.f32 1.442695, %v291_v12  ;;  %v296_v22 = vmul.f32 1.442695, %v295_v15 }
 0x128   :  { %628 = vpow2.f32 %v272_v4 }
 0x129   :  { %630 = vpow2.f32 %v276_v6 }
 0x12a   :  { %632 = vpow2.f32 %v280_v8 }
 0x12b   :  { %634 = vpow2.f32 %v284_v11 }
 0x12c   :  { %636 = vpow2.f32 %v288_v16 }
 0x12d   :  { %v627_v17 = vpop.eup %626  ;;  %638 = vpow2.f32 %v292_v19 }
 0x12e   :  { %v629_v18 = vpop.eup %628  ;;  %640 = vpow2.f32 %v296_v22 }
 0x12f   :  { %v274_v20 = vadd.f32 %v629_v18, %v627_v17  ;;  %v631_v21 = vpop.eup %630 }
 0x130   :  { %v633_v24 = vpop.eup %632 }
 0x131   :  { %v278_v23 = vadd.f32 %v631_v21, %v274_v20  ;;  %v635_v26 = vpop.eup %634 }
 0x132   :  { %v637_v29 = vpop.eup %636 }
 0x133   :  { %v282_v25 = vadd.f32 %v633_v24, %v278_v23  ;;  %v639_v31 = vpop.eup %638 }
 0x134   :  { %v641_v33 = vpop.eup %640 }
 0x135   :  { %v286_v27 = vadd.f32 %v635_v26, %v282_v25 }
 0x137   :  { %v290_v30 = vadd.f32 %v637_v29, %v286_v27 }
 0x139   :  { %v294_v32 = vadd.f32 %v639_v31, %v290_v30 }
 0x13b   :  { %v298_v35 = vadd.f32 %v641_v33, %v294_v32 }
 0x13d   :  { %642 = vlog2.f32 %v298_v35 }
 0x142   :  { %v555_v40 = vpop.xlane.xlu0 %554 }
 0x143   :  { %v643_v36 = vpop.eup %642  ;;  %v556_v41 = vrot.slane %v555_v40, 4 }
 0x144   :  { %v300_v37 = vmul.f32 0.6931472, %v643_v36 }
 0x145   :  { %v557_v42 = vadd.f32 %v556_v41, %v555_v40 }
 0x146   :  { %v301_v38 = vadd.f32 %v300_v37, %v267_v0 }
 0x147   :  { %v558_v43 = vrot.slane %v557_v42, 2 }
 0x148   :  { %v303_v39 = vsel %vm302_vm1, %v301_v38, 0.0 }
 0x149   :  { %304 = vadd.xlane.f32.xlu2 %v303_v39  ;;  %v559_v47 = vadd.f32 %v558_v43, %v557_v42 }
 0x14b   :  { %v560_v9 = vrot.slane %v559_v47, 1 }
 0x14d   :  { %v561_v51 = vadd.f32 %v560_v9, %v559_v47 }
 0x1bc   :  { %v305_v44 = vpop.xlane.xlu2 %304 }
 0x1bd   :  { %v306_v45 = vrot.slane %v305_v44, 4 }
 0x1bf   :  { %v307_v46 = vadd.f32 %v306_v45, %v305_v44 }
 0x1c1   :  { %v308_v48 = vrot.slane %v307_v46, 2 }
 0x1c3   :  { %v309_v49 = vadd.f32 %v308_v48, %v307_v46 }
 0x1c5   :  { %v310_v50 = vrot.slane %v309_v49, 1 }
 0x1c7   :  { %v311_v14 = vadd.f32 %v310_v50, %v309_v49 }
 0x1c9   :  { %620 = vpush %v311_v14 }
 0x1ca   :  { %622 = vpush %v561_v51 }
 0x1fa   :  { %s621_s2 = spop %620 }
 0x1fb   :  { %s623_s14 = spop %622 }
 0x1fc   :  { %s563_s18 = ssub.f32 %s621_s2, %s623_s14 }
 0x1fe   :  { %s564_s19 = smul.f32 0.0078125, %s563_s18 }
 0x200   :  { %566 = sst [smem:[#allocation2]] %s564_s19 }
 0x201   :  { %575 = dma.smem_to_hbm %s658_s20, 16, %s573_s17, [#allocation3]  }
 0x202   :  { %656 = dma.done.wait [#allocation3], 16  }
 0x203   :  { %657 = vsyncadd [#allocation3], 4294967280 }
 0x204   :  { %580 = sfence }
 0x205   :  { %581 = vsyncpa [#allocation3], 1 }

</bundles_post_ra>
